<compile_context>
chip_gen: v7x
topology: tpu7x:2x2x1
jax: 0.10.0
libtpu: 0.0.40
codegen_flags: <defaults>
</compile_context>

<pallas_src>
import functools

import jax
import jax.numpy as jnp
from jax import lax
from jax.experimental import pallas as pl
from jax.experimental.pallas import tpu as pltpu


def _softplus_neg(z):
    # BCEWithLogits(z, target=1) == softplus(-z), computed stably:
    #   softplus(-z) = max(-z, 0) + log1p(exp(-|z|))
    return jnp.maximum(-z, 0.0) + jnp.log1p(jnp.exp(-jnp.abs(z)))


# ---- Kernels -----------------------------------------------------------------


def _dloss_rs_single_kernel(x_ref, g_ref, o_ref, *, inv_total):
    """Single-tile fast path: everything in one pipeline step."""
    x = x_ref[...].astype(jnp.float32)
    g = g_ref[...].astype(jnp.float32)
    loss = _softplus_neg(x - g)
    o_ref[...] = jnp.zeros_like(o_ref) + jnp.sum(loss) * inv_total


def _dloss_rs_tiled_kernel(x_ref, g_ref, o_ref, acc_ref, *,
                           tiles_per_core, tm, sub, total_rows, mask_tail):
    """Tiled path: grid = (parallel cores, row tiles per core).

    Per grid step, an unrolled loop over `sub`-row chunks upcasts, evaluates
    softplus, (optionally) masks tail rows, and accumulates into a (sub, N)
    f32 VMEM accumulator with pure VPU adds.  A single cross-lane reduction
    happens only in the last step of each core.
    """
    j = pl.program_id(1)

    @pl.when(j == 0)
    def _():
        acc_ref[...] = jnp.zeros_like(acc_ref)

    row_base = (pl.program_id(0) * tiles_per_core + j) * tm

    def body(c, carry):
        r0 = pl.multiple_of(c * sub, sub)
        x = x_ref[pl.ds(r0, sub), :].astype(jnp.float32)
        g = g_ref[pl.ds(r0, sub), :].astype(jnp.float32)
        loss = _softplus_neg(x - g)
        if mask_tail:
            rows = row_base + r0 + lax.broadcasted_iota(jnp.int32, (sub, 1), 0)
            loss = jnp.where(rows < total_rows, loss, 0.0)
        acc_ref[...] += loss
        return carry

    lax.fori_loop(0, tm // sub, body, 0, unroll=True)

    @pl.when(j == pl.num_programs(1) - 1)
    def _():
        # Exactly one full cross-lane reduction per core.
        o_ref[...] = jnp.zeros_like(o_ref) + jnp.sum(acc_ref[...])


# ---- Wrapper / tiling policy -------------------------------------------------

_SMALL_PAIR_F32_BYTES = 1 * 1024 * 1024    # fast path if both operands, as f32,
                                           # fit in ~1 MiB (v5e-safe, latency path)
_INPUT_VMEM_BUDGET = 8 * 1024 * 1024       # 2 inputs x 2 pipeline buffers (input dtype)
_MAX_TILE_ROWS = 512                       # elementwise roofline plateaus ~1-2 MiB tiles
_MIN_STEPS_PER_CORE = 4                    # keep DMA/compute overlap on medium shapes
_SUB_ROWS = 64                             # sub-chunk rows (bf16- and f32-tile aligned)
_VMEM_LIMIT_BYTES = 32 * 1024 * 1024       # explicit; safe on v5e/v6e/v7x


def _round_up(x, m):
    return ((x + m - 1) // m) * m


def _num_tensorcores():
    """Best-effort TensorCore count; defaults to 1 (safe on v5e/v6e)."""
    try:
        info = pltpu.get_tpu_info()
    except Exception:
        return 1
    for name in ("num_cores", "core_count", "num_tensorcores",
                 "tensorcore_count", "cores_per_chip",
                 "num_tensorcores_per_chip"):
        v = getattr(info, name, None)
        if isinstance(v, int) and v > 0:
            return max(1, min(v, 2))
    return 1


def _pick_tiling(B, N, itemsize, cores):
    """Tile rows (multiple of the sub-chunk), sub-chunk rows, #tiles, #cores."""
    sub = _SUB_ROWS if B >= _SUB_ROWS else _round_up(max(B, 1), 8)
    # Budget only the raw input buffers here; f32 intermediates are bounded by
    # the sub-chunk restructuring in the kernel body.
    cap = _INPUT_VMEM_BUDGET // max(1, 4 * N * itemsize)   # 2 inputs * 2 buffers
    cap = min(int(cap), _MAX_TILE_ROWS)
    # Guarantee >= _MIN_STEPS_PER_CORE grid steps per core for pipelining.
    min_steps_cap = pl.cdiv(B, cores * _MIN_STEPS_PER_CORE)
    tm = min(cap, min_steps_cap, _round_up(B, sub))
    tm = max(sub, (tm // sub) * sub)
    n_tiles = pl.cdiv(B, tm)                               # tail tile masked in-kernel
    P = cores if (cores > 1 and n_tiles % cores == 0
                  and n_tiles >= 2 * cores) else 1
    return tm, sub, n_tiles, P


def dloss_rs(logitX, logitG):
    """RS-GAN discriminator loss: mean(softplus(logitG - logitX))."""
    assert logitX.shape == logitG.shape
    x, g = logitX, logitG
    if x.ndim == 1:
        x, g = x.reshape(1, -1), g.reshape(1, -1)
    elif x.ndim != 2:
        x, g = x.reshape(x.shape[0], -1), g.reshape(g.shape[0], -1)

    B, N = x.shape
    total = B * N
    itemsize = jnp.dtype(x.dtype).itemsize
    in_bytes = 2 * total * itemsize
    cost = pl.CostEstimate(
        flops=5 * total, transcendentals=2 * total, bytes_accessed=in_bytes + 4
    )

    # Fast path threshold is based on f32-expanded size, not raw input bytes.
    if 2 * total * 4 <= _SMALL_PAIR_F32_BYTES:
        out = pl.pallas_call(
            functools.partial(_dloss_rs_single_kernel, inv_total=1.0 / total),
            out_shape=jax.ShapeDtypeStruct((1, 1), jnp.float32),
            grid_spec=pltpu.PrefetchScalarGridSpec(
                num_scalar_prefetch=0,
                grid=(1,),
                in_specs=[
                    pl.BlockSpec((B, N), lambda i: (0, 0)),
                    pl.BlockSpec((B, N), lambda i: (0, 0)),
                ],
                out_specs=pl.BlockSpec((1, 1), lambda i: (0, 0)),
            ),
            compiler_params=pltpu.CompilerParams(
                dimension_semantics=("arbitrary",)
            ),
            cost_estimate=cost,
        )(x, g)
        return out[0, 0]

    # Tiled path.
    cores = _num_tensorcores()
    tm, sub, n_tiles, P = _pick_tiling(B, N, itemsize, cores)
    tiles_per_core = n_tiles // P
    mask_tail = (B % tm) != 0

    kernel = functools.partial(
        _dloss_rs_tiled_kernel,
        tiles_per_core=tiles_per_core, tm=tm, sub=sub,
        total_rows=B, mask_tail=mask_tail)

    # TODO(synk): on v7x, if xprof shows one TensorCore idle, switch the
    # leading axis to pltpu.CORE_PARALLEL (plain "parallel" may not shard it).
    partials = pl.pallas_call(
        kernel,
        out_shape=jax.ShapeDtypeStruct((P, 1, 1), jnp.float32),
        grid_spec=pltpu.PrefetchScalarGridSpec(
            num_scalar_prefetch=0,
            grid=(P, tiles_per_core),
            in_specs=[
                pl.BlockSpec((tm, N),
                             lambda p, j, t=tiles_per_core: (p * t + j, 0)),
                pl.BlockSpec((tm, N),
                             lambda p, j, t=tiles_per_core: (p * t + j, 0)),
            ],
            out_specs=pl.BlockSpec((1, 1, 1), lambda p, j: (p, 0, 0)),
            scratch_shapes=[pltpu.VMEM((sub, N), jnp.float32)],
        ),
        compiler_params=pltpu.CompilerParams(
            dimension_semantics=("parallel", "arbitrary"),
            vmem_limit_bytes=_VMEM_LIMIT_BYTES,
        ),
        cost_estimate=cost,
    )(x, g)
    # Combine per-core partial sums and normalize.
    return jnp.sum(partials) * (1.0 / total)


def dloss_rs_reference(logitX, logitG):
    x = logitX.astype(jnp.float32)
    g = logitG.astype(jnp.float32)
    z = x - g
    return jnp.mean(jnp.maximum(-z, 0.0) + jnp.log1p(jnp.exp(-jnp.abs(z))))


# TODO(synk): only the training_method == 'RS' branch of DLoss is implemented
# (that is the module's configured mode); the 'JS' branch is not translated.

if __name__ == "__main__":
    key = jax.random.PRNGKey(0)
    kx, kg = jax.random.split(key)

    # Small shape (exercises the single-step fast path).
    logitX = jax.random.normal(kx, (16, 128), dtype=jnp.float32)
    logitG = jax.random.normal(kg, (16, 128), dtype=jnp.float32)
    loss = jax.block_until_ready(dloss_rs(logitX, logitG))
    ref = jax.block_until_ready(dloss_rs_reference(logitX, logitG))
    assert jnp.allclose(loss, ref, rtol=1e-5, atol=1e-5), (loss, ref)

    # Batch with no friendly divisor (exercises cdiv tiling + tail-row mask).
    mx = jax.random.normal(kx, (1000, 256), dtype=jnp.float32)
    mg = jax.random.normal(kg, (1000, 256), dtype=jnp.float32)
    loss1 = jax.block_until_ready(dloss_rs(mx, mg))
    ref1 = jax.block_until_ready(dloss_rs_reference(mx, mg))
    assert jnp.allclose(loss1, ref1, rtol=2e-5, atol=1e-6), (loss1, ref1)

    # Larger bf16 shape (exercises the tiled path and in-kernel bf16->f32
    # upcast; bf16 halves the HBM read traffic).
    bx = jax.random.normal(kx, (2048, 512), dtype=jnp.bfloat16)
    bg = jax.random.normal(kg, (2048, 512), dtype=jnp.bfloat16)
    loss2 = jax.block_until_ready(dloss_rs(bx, bg))
    ref2 = jax.block_until_ready(dloss_rs_reference(bx, bg))
    assert jnp.allclose(loss2, ref2, rtol=1e-4, atol=1e-5), (loss2, ref2)

    print("KERNEL_OK")
</pallas_src>

<mosaic_0001>
module attributes {stable_mosaic.version = 11 : i64} {
  func.func @_dloss_rs_single_kernel(%arg0: i32, %arg1: memref<16x128xf32, #tpu.memory_space<vmem>>, %arg2: memref<16x128xf32, #tpu.memory_space<vmem>>, %arg3: memref<1x1xf32, #tpu.memory_space<vmem>>) attributes {dimension_semantics = [#tpu.dimension_semantics<arbitrary>], iteration_bounds = array<i64: 1>, scalar_prefetch = 0 : i64, scratch_operands = 0 : i64, tpu.core_type = #tpu.core_type<tc>, window_params = [{pipeline_mode = #tpu.pipeline_mode<synchronous>, transform_indices = @transform_0, window_bounds = array<i64: 16, 128>}, {pipeline_mode = #tpu.pipeline_mode<synchronous>, transform_indices = @transform_1, window_bounds = array<i64: 16, 128>}, {pipeline_mode = #tpu.pipeline_mode<synchronous>, transform_indices = @transform_2, window_bounds = array<i64: 1, 1>}]} {
    %c0 = arith.constant 0 : index
    %c0_0 = arith.constant 0 : index
    %0 = vector.load %arg1[%c0, %c0_0] : memref<16x128xf32, #tpu.memory_space<vmem>>, vector<16x128xf32>
    %c0_1 = arith.constant 0 : index
    %c0_2 = arith.constant 0 : index
    %1 = vector.load %arg2[%c0_1, %c0_2] : memref<16x128xf32, #tpu.memory_space<vmem>>, vector<16x128xf32>
    %2 = arith.subf %0, %1 : vector<16x128xf32>
    %cst = arith.constant 0.000000e+00 : f32
    %3 = vector.broadcast %cst : f32 to vector<16x128xf32>
    %4 = arith.subf %3, %2 : vector<16x128xf32>
    %cst_3 = arith.constant 0.000000e+00 : f32
    %5 = vector.broadcast %cst_3 : f32 to vector<16x128xf32>
    %6 = arith.maximumf %4, %5 : vector<16x128xf32>
    %7 = math.absf %2 : vector<16x128xf32>
    %cst_4 = arith.constant 0.000000e+00 : f32
    %8 = vector.broadcast %cst_4 : f32 to vector<16x128xf32>
    %9 = arith.subf %8, %7 : vector<16x128xf32>
    %10 = math.exp %9 : vector<16x128xf32>
    %11 = math.log1p %10 : vector<16x128xf32>
    %12 = arith.addf %6, %11 : vector<16x128xf32>
    %cst_5 = arith.constant 0.000000e+00 : f32
    %13 = vector.broadcast %cst_5 : f32 to vector<1x1xf32>
    %14 = vector.shape_cast %12 : vector<16x128xf32> to vector<1x16x128xf32>
    %cst_6 = arith.constant dense<0.000000e+00> : vector<1xf32>
    %15 = vector.multi_reduction <add>, %14, %cst_6 [1, 2] : vector<1x16x128xf32> to vector<1xf32>
    %16 = vector.shape_cast %15 : vector<1xf32> to vector<1x1x1xf32>
    %17 = vector.extract %16[0, 0, 0] : f32 from vector<1x1x1xf32>
    %cst_7 = arith.constant 4.8828125E-4 : f32
    %18 = arith.mulf %17, %cst_7 : f32
    %19 = vector.broadcast %18 : f32 to vector<1x1xf32>
    %20 = arith.addf %13, %19 : vector<1x1xf32>
    %c0_8 = arith.constant 0 : index
    %c0_9 = arith.constant 0 : index
    %21 = vector.load %arg3[%c0_8, %c0_9] : memref<1x1xf32, #tpu.memory_space<vmem>>, vector<1x1xf32>
    tpu.vector_store %arg3[%c0_8, %c0_9], %20 {strides = array<i32>} : memref<1x1xf32, #tpu.memory_space<vmem>>, vector<1x1xf32>,
    return
  }
  func.func @transform_0(%arg0: i32) -> (i32, i32) {
    %c0_i32 = arith.constant 0 : i32
    %c0_i32_0 = arith.constant 0 : i32
    %c0_i32_1 = arith.constant 0 : i32
    return %c0_i32, %c0_i32_0 : i32, i32
  }
  func.func @transform_1(%arg0: i32) -> (i32, i32) {
    %c0_i32 = arith.constant 0 : i32
    %c0_i32_0 = arith.constant 0 : i32
    %c0_i32_1 = arith.constant 0 : i32
    return %c0_i32, %c0_i32_0 : i32, i32
  }
  func.func @transform_2(%arg0: i32) -> (i32, i32) {
    %c0_i32 = arith.constant 0 : i32
    %c0_i32_0 = arith.constant 0 : i32
    %c0_i32_1 = arith.constant 0 : i32
    return %c0_i32, %c0_i32_0 : i32, i32
  }
}

</mosaic_0001>

<bundles_post_ra>
// kernel: tpu_custom_call.1
= control target key start
LH: loop header
LB: loop body
LE: loop exit
PB: predicated region body
PF: predicated region fallthrough
CT: control target
= control target key end

     0   :  { %7 = vsyncpa [#allocation3], 0  ;;  %s252_s0 = inlined_call_operand.hbm [shape: f32[16,128], index: 0, kind: input, shape index: {}]   ;;  %s253_s1 = inlined_call_operand.hbm [shape: f32[16,128], index: 1, kind: input, shape index: {}]   ;;  %s254_s2 = inlined_call_operand.hbm [shape: f32[1,1], index: 2, kind: output, shape index: {}]  }
   0x1   :  { %8 = vsyncpa [#allocation6], 0 }
   0x2   :  { %9 = vsyncpa [#allocation4], 0  ;;  %s196_s9 = smov [#allocation2]   ;;  %s124_s13 = scalar_lea.hbm %s252_s0, 256 }
   0x3   :  { %s15_s10 = sshll.u32 %s196_s9, 4  ;;  %p125_p0 = scmp.ne.s32.totalorder %s252_s0, %s124_s13  ;;  %s16_s10 = int_to_ptr.vmem [resolvable:$true] %s15_s10 }
   0x4   :  { %p128_p1 = scmp.lt.u32.totalorder %s124_s13, %s252_s0 }
   0x6   :  { %p130_p2 = pnand %p128_p1, %p125_p0 }
   0x8   :  { %133 = shalt.err (!%p130_p2)
}
   0x9   :  { %s134_s18 = scalar_lea.vmem %s16_s10, 256  ;;  %p139_p4 = scmp.lt.s32.totalorder %s16_s10, %s16_s10 }
   0xa   :  { %p135_p3 = scmp.ne.s32.totalorder %s16_s10, %s134_s18  ;;  %p140_p5 = scmp.lt.s32.totalorder %s134_s18, %s134_s18 }
   0xc   :  { %p141_p6 = por %p140_p5, %p139_p4 }
   0xe   :  { %p142_p7 = pnand %p141_p6, %p135_p3 }
  0x10   :  { %145 = shalt.err (!%p142_p7)
}
  0x11   :  { %s197_s19 = smov 128   ;;  %s198_s20 = smov 8  }
  0x12   :  { %21 = dma.hbm_to_vmem [thread:$0]  %s252_s0, 256, %s16_s10, [#allocation3], %s197_s19, %s197_s19, %s198_s20  }
  0x13   :  { %s199_s23 = smov [#allocation5]   ;;  %s146_s27 = scalar_lea.hbm %s253_s1, 256 }
  0x14   :  { %s27_s24 = sshll.u32 %s199_s23, 4  ;;  %p147_p8 = scmp.ne.s32.totalorder %s253_s1, %s146_s27  ;;  %s28_s24 = int_to_ptr.vmem [resolvable:$true] %s27_s24 }
  0x15   :  { %p150_p9 = scmp.lt.u32.totalorder %s146_s27, %s253_s1 }
  0x17   :  { %p152_p10 = pnand %p150_p9, %p147_p8 }
  0x19   :  { %155 = shalt.err (!%p152_p10)
}
  0x1a   :  { %s156_s4 = scalar_lea.vmem %s28_s24, 256  ;;  %p161_p12 = scmp.lt.s32.totalorder %s28_s24, %s28_s24 }
  0x1b   :  { %p157_p11 = scmp.ne.s32.totalorder %s28_s24, %s156_s4  ;;  %p162_p13 = scmp.lt.s32.totalorder %s156_s4, %s156_s4 }
  0x1d   :  { %p163_p0 = por %p162_p13, %p161_p12 }
  0x1f   :  { %p164_p1 = pnand %p163_p0, %p157_p11 }
  0x21   :  { %167 = shalt.err (!%p164_p1)
}
  0x22   :  { %33 = dma.hbm_to_vmem [thread:$0]  %s253_s1, 256, %s28_s24, [#allocation6], %s197_s19, %s197_s19, %s198_s20  }
  0x23   :  { %190 = dma.done.wait [#allocation3], 256  }
  0x24   :  { %191 = vsyncadd [#allocation3], 4294967040 }
  0x25   :  { %192 = dma.done.wait [#allocation6], 256  }
  0x26   :  { %193 = vsyncadd [#allocation6], 4294967040  ;;  %v40_v0 = vld [vmem:[#allocation2] sm:$0xff]  ;;  %v41_v1 = vld [vmem:[#allocation2 + $0x8] sm:$0xff]  ;;  %s200_s1 = smov [#allocation7]   ;;  %vm91_vm2 = vcmask 0  }
  0x27   :  { %v42_v2 = vld [vmem:[#allocation5] sm:$0xff]  ;;  %v43_v3 = vld [vmem:[#allocation5 + $0x8] sm:$0xff]  ;;  %s99_s6 = sshll.u32 %s200_s1, 4  ;;  %s100_s6 = int_to_ptr.vmem [resolvable:$true] %s99_s6 }
  0x28   :  { %v44_v4 = vsub.f32 %v40_v0, %v42_v2  ;;  %v45_v5 = vsub.f32 %v41_v1, %v43_v3  ;;  %s168_s9 = scalar_lea.vmem %s100_s6, 16  ;;  %s172_s10 = scalar_lea.vmem %s100_s6, 32 }
  0x29   :  { %p169_p2 = scmp.ne.s32.totalorder %s100_s6, %s168_s9  ;;  %p173_p3 = scmp.lt.s32.totalorder %s100_s6, %s100_s6 }
  0x2a   :  { %v50_v6 = vand.u32 2147483647, %v44_v4  ;;  %v51_v7 = vand.u32 2147483647, %v45_v5  ;;  %v46_v19 = vsub.f32 0.0, %v44_v4  ;;  %v47_v22 = vsub.f32 0.0, %v45_v5  ;;  %p174_p4 = scmp.lt.s32.totalorder %s172_s10, %s168_s9 }
  0x2c   :  { %v52_v8 = vsub.f32 0.0, %v50_v6  ;;  %v53_v9 = vsub.f32 0.0, %v51_v7  ;;  %v48_v26 = vmax.f32 %v46_v19, 0.0  ;;  %v49_v29 = vmax.f32 %v47_v22, 0.0  ;;  %p175_p5 = por %p174_p4, %p173_p3 }
  0x2e   :  { %v54_v10 = vmul.f32 1.442695, %v52_v8  ;;  %v56_v11 = vmul.f32 1.442695, %v53_v9  ;;  %p176_p6 = pnand %p175_p5, %p169_p2 }
  0x30   :  { %116 = vpow2.f32 %v54_v10 }
  0x31   :  { %118 = vpow2.f32 %v56_v11 }
  0x3a   :  { %v117_v12 = vpop.eup %116 }
  0x3b   :  { %v119_v13 = vpop.eup %118  ;;  %v58_v14 = vadd.f32 1.0, %v117_v12  ;;  %v61_v16 = vmul.f32 -0.5, %v117_v12  ;;  %v64_v20 = vand.u32 2147483647, %v117_v12 }
  0x3c   :  { %v67_v15 = vadd.f32 1.0, %v119_v13  ;;  %v70_v17 = vmul.f32 -0.5, %v119_v13  ;;  %v73_v23 = vand.u32 2147483647, %v119_v13 }
  0x3d   :  { %120 = vlog2.f32 %v58_v14  ;;  %v62_v18 = vadd.f32 1.0, %v61_v16  ;;  %vm65_vm0 = vcmp.lt.f32.partialorder %v64_v20, 0.0004427343 }
  0x3e   :  { %122 = vlog2.f32 %v67_v15  ;;  %v71_v21 = vadd.f32 1.0, %v70_v17  ;;  %vm74_vm1 = vcmp.lt.f32.partialorder %v73_v23, 0.0004427343 }
  0x3f   :  { %v63_v24 = vmul.f32 %v117_v12, %v62_v18 }
  0x40   :  { %v72_v27 = vmul.f32 %v119_v13, %v71_v21 }
  0x47   :  { %v121_v25 = vpop.eup %120 }
  0x48   :  { %v123_v28 = vpop.eup %122  ;;  %v60_v30 = vmul.f32 0.6931472, %v121_v25 }
  0x49   :  { %v69_v31 = vmul.f32 0.6931472, %v123_v28 }
  0x4a   :  { %v66_v32 = vsel %vm65_vm0, %v63_v24, %v60_v30 }
  0x4b   :  { %v75_v33 = vsel %vm74_vm1, %v72_v27, %v69_v31  ;;  %v76_v34 = vadd.f32 %v66_v32, %v48_v26 }
  0x4c   :  { %v77_v35 = vadd.f32 %v75_v33, %v49_v29 }
  0x4e   :  { %v78_v36 = vadd.f32 %v77_v35, %v76_v34 }
  0x50   :  { %79 = vadd.xlane.f32.xlu0 %v78_v36 }
  0xdd   :  { %v80_v37 = vpop.xlane.xlu0 %79 }
  0xde   :  { %v81_v38 = vrot.slane %v80_v37, 4 }
  0xe0   :  { %v82_v39 = vadd.f32 %v81_v38, %v80_v37 }
  0xe2   :  { %v83_v40 = vrot.slane %v82_v39, 2 }
  0xe4   :  { %v84_v41 = vadd.f32 %v83_v40, %v82_v39 }
  0xe6   :  { %v85_v42 = vrot.slane %v84_v41, 1 }
  0xe8   :  { %v86_v43 = vadd.f32 %v85_v42, %v84_v41 }
  0xea   :  { %109 = vpush %v86_v43 }
 0x11b   :  { %s110_s7 = spop %109 }
 0x11c   :  { %s88_s8 = smul.f32 0.00048828125, %s110_s7 }
 0x11e   :  { %v89_v44 = vstv %s88_s8 }
 0x11f   :  { %92 = vst.msk [vmem:[#allocation7] sm:$0x1] %vm91_vm2, %v89_v44 }
 0x120   :  { %179 = shalt.err (!%p176_p6)
}
 0x121   :  { %s180_s13 = scalar_lea.hbm %s254_s2, 16 }
 0x122   :  { %p181_p7 = scmp.ne.s32.totalorder %s254_s2, %s180_s13  ;;  %p184_p8 = scmp.lt.u32.totalorder %s180_s13, %s254_s2 }
 0x124   :  { %p186_p9 = pnand %p184_p8, %p181_p7 }
 0x126   :  { %189 = shalt.err (!%p186_p9)
}
 0x127   :  { %102 = dma.vmem_to_hbm [thread:$0]  %s100_s6, 16, %s254_s2, [#allocation4]  }
 0x128   :  { %194 = dma.done.wait [#allocation4], 16  }
 0x129   :  { %195 = vsyncadd [#allocation4], 4294967280 }
 0x12a   :  { %106 = vsyncpa [#allocation3], 1 }
 0x12b   :  { %107 = vsyncpa [#allocation6], 1 }
 0x12c   :  { %108 = vsyncpa [#allocation4], 1 }

</bundles_post_ra>
